<compile_context>
chip_gen: v7x
topology: tpu7x:2x2x1
jax: 0.10.0
libtpu: 0.0.40
codegen_flags: <defaults>
</compile_context>

<pallas_src>
import jax
import jax.numpy as jnp
from jax.experimental import pallas as pl
from jax.experimental.pallas import tpu as pltpu


def _round_up(x: int, m: int) -> int:
    return (x + m - 1) // m * m


def _pwff_kernel(x_ref, w1t_ref, b1_ref, w2t_ref, b2_ref, o_ref):
    # x_ref: (tm, Hp) compute dtype    w*t_ref: (Hp, Hp) compute dtype
    # b*_ref: (1, Hp) f32              o_ref:  (tm, Hp) output dtype
    x = x_ref[...]

    # conv1 (k=1) == x @ W1^T + b1; f32 accumulation on the MXU.
    h = jnp.dot(x, w1t_ref[...], preferred_element_type=jnp.float32)
    h = jnp.maximum(h + b1_ref[...], 0.0)                     # bias + ReLU

    # conv2 (k=1) == h @ W2^T; feed the MXU in the compute dtype.
    y = jnp.dot(h.astype(w2t_ref.dtype), w2t_ref[...],
                preferred_element_type=jnp.float32)

    # Fold bias2 into the residual add (single VPU pass over the tile).
    # TODO(synk): dropout1/dropout2 are identity (eval-mode forward).
    o_ref[...] = (y + (x.astype(jnp.float32) + b2_ref[...])).astype(o_ref.dtype)


def prepare_pwff_params(w1, b1, w2, b2, *, compute_dtype=jnp.float32):
    """One-time (model-init) prep: transpose, cast, lane-pad channels to 128.

    w1, w2: (H_out, H_in) Conv1d(k=1) weights;  b1, b2: (H,) biases.
    Returns (w1t, b1r, w2t, b2r) ready for `pointwise_feedforward`.
    """
    H = w1.shape[0]
    Hp = _round_up(H, 128)
    w1t = jnp.transpose(w1).astype(compute_dtype)   # (H_in, H_out): kernel does x @ W^T
    w2t = jnp.transpose(w2).astype(compute_dtype)
    b1p = b1.astype(jnp.float32)
    b2p = b2.astype(jnp.float32)
    if Hp != H:
        pad2d = ((0, Hp - H), (0, Hp - H))
        w1t = jnp.pad(w1t, pad2d)
        w2t = jnp.pad(w2t, pad2d)
        b1p = jnp.pad(b1p, (0, Hp - H))
        b2p = jnp.pad(b2p, (0, Hp - H))
    return w1t, b1p.reshape(1, Hp), w2t, b2p.reshape(1, Hp)


def pointwise_feedforward(x, w1t, b1r, w2t, b2r, *, tile_m=512):
    """x: (B, L, H). Params must come from `prepare_pwff_params`."""
    B, L, H = x.shape
    Hp = w1t.shape[0]
    M = B * L
    compute_dtype = w1t.dtype
    out_dtype = x.dtype

    # Flatten rows; cast to the matmul dtype; lane-pad channels to Hp.
    x2d = x.reshape(M, H)
    if x2d.dtype != compute_dtype:
        x2d = x2d.astype(compute_dtype)
    if Hp != H:
        x2d = jnp.pad(x2d, ((0, 0), (0, Hp - H)))

    # Row tile: as large as requested, shrunk for tiny inputs, always a
    # multiple of the sublane packing (8 for f32, 16 for bf16); pad the tail
    # instead of asserting divisibility.
    row_mult = 16 if compute_dtype == jnp.bfloat16 else 8
    tm = min(tile_m, _round_up(M, row_mult))
    tm = _round_up(tm, row_mult)
    Mp = _round_up(M, tm)
    if Mp != M:
        x2d = jnp.pad(x2d, ((0, Mp - M), (0, 0)))

    grid = (Mp // tm,)

    # VMEM budget: resident weights + double-buffered row tiles + biases.
    wbytes = jnp.dtype(compute_dtype).itemsize
    obytes = jnp.dtype(out_dtype).itemsize
    vmem_need = (2 * 2 * Hp * Hp * wbytes        # W1^T, W2^T (assume 2x buffered)
                 + 2 * tm * Hp * wbytes          # x tile (double-buffered)
                 + 2 * tm * Hp * obytes          # out tile (double-buffered)
                 + 2 * 2 * Hp * 4)               # biases
    vmem_limit = None
    if vmem_need > (16 << 20):
        # Raise the scoped-VMEM limit only when needed; stay under v7x's
        # 64 MiB physical ceiling.
        vmem_limit = min(int(vmem_need * 1.25) + (2 << 20), 60 << 20)
    # TODO(synk): for H >= ~2048 add an N/K weight-tiling grid axis with a f32
    # VMEM accumulator instead of whole-(Hp,Hp) resident weights (v7x budget).

    cost = pl.CostEstimate(
        flops=4 * Mp * Hp * Hp,
        transcendentals=0,
        bytes_accessed=(Mp * Hp * (wbytes + obytes)
                        + 2 * Hp * Hp * wbytes + 2 * Hp * 4),
    )

    out2d = pl.pallas_call(
        _pwff_kernel,
        out_shape=jax.ShapeDtypeStruct((Mp, Hp), out_dtype),
        grid_spec=pltpu.PrefetchScalarGridSpec(
            num_scalar_prefetch=0,
            grid=grid,
            in_specs=[
                pl.BlockSpec((tm, Hp), lambda i: (i, 0)),   # x row tile
                pl.BlockSpec((Hp, Hp), lambda i: (0, 0)),   # W1^T (resident)
                pl.BlockSpec((1, Hp), lambda i: (0, 0)),    # b1
                pl.BlockSpec((Hp, Hp), lambda i: (0, 0)),   # W2^T (resident)
                pl.BlockSpec((1, Hp), lambda i: (0, 0)),    # b2
            ],
            out_specs=pl.BlockSpec((tm, Hp), lambda i: (i, 0)),
        ),
        compiler_params=pltpu.CompilerParams(
            dimension_semantics=("parallel",),   # row grid splits across v7x TCs
            vmem_limit_bytes=vmem_limit,
        ),
        cost_estimate=cost,
    )(x2d, w1t, b1r, w2t, b2r)

    return out2d[:M, :H].reshape(B, L, H)


def _reference(x, w1, b1, w2, b2):
    # Pure-JAX reference matching the PyTorch forward (eval mode).
    h = jnp.einsum("blh,oh->blo", x, w1) + b1
    h = jnp.maximum(h, 0.0)
    y = jnp.einsum("blh,oh->blo", h, w2) + b2
    return y + x


if __name__ == "__main__":
    B, L, H = 2, 8, 32          # batch, seq length, hidden_units
    key = jax.random.PRNGKey(0)
    kx, k1, k2, k3, k4 = jax.random.split(key, 5)

    x = jax.random.normal(kx, (B, L, H), dtype=jnp.float32)
    # Conv1d(H, H, kernel_size=1): weight (out_ch, in_ch), bias (out_ch,).
    w1 = jax.random.normal(k1, (H, H), dtype=jnp.float32) * 0.1
    b1 = jax.random.normal(k2, (H,), dtype=jnp.float32) * 0.1
    w2 = jax.random.normal(k3, (H, H), dtype=jnp.float32) * 0.1
    b2 = jax.random.normal(k4, (H,), dtype=jnp.float32) * 0.1

    # One-time param prep (transpose / pad) hoisted out of the forward call.
    # compute_dtype=jnp.bfloat16 is the production choice for MXU throughput;
    # f32 here so the check vs the f32 reference holds at 1e-5.
    params = prepare_pwff_params(w1, b1, w2, b2, compute_dtype=jnp.float32)

    out = pointwise_feedforward(x, *params)
    out = jax.block_until_ready(out)

    ref = _reference(x, w1, b1, w2, b2)
    assert out.shape == (B, L, H)
    assert jnp.allclose(out, ref, atol=1e-5, rtol=1e-5), "mismatch vs reference"

    print("KERNEL_OK")
</pallas_src>

<mosaic_0001>
module attributes {stable_mosaic.version = 11 : i64} {
  func.func @_pwff_kernel(%arg0: i32, %arg1: memref<16x128xf32, #tpu.memory_space<vmem>>, %arg2: memref<128x128xf32, #tpu.memory_space<vmem>>, %arg3: memref<1x128xf32, #tpu.memory_space<vmem>>, %arg4: memref<128x128xf32, #tpu.memory_space<vmem>>, %arg5: memref<1x128xf32, #tpu.memory_space<vmem>>, %arg6: memref<16x128xf32, #tpu.memory_space<vmem>>) attributes {dimension_semantics = [#tpu.dimension_semantics<parallel>], iteration_bounds = array<i64: 1>, scalar_prefetch = 0 : i64, scratch_operands = 0 : i64, tpu.core_type = #tpu.core_type<tc>, window_params = [{transform_indices = @transform_0, window_bounds = array<i64: 16, 128>}, {pipeline_mode = #tpu.pipeline_mode<synchronous>, transform_indices = @transform_1, window_bounds = array<i64: 128, 128>}, {pipeline_mode = #tpu.pipeline_mode<synchronous>, transform_indices = @transform_2, window_bounds = array<i64: 1, 128>}, {pipeline_mode = #tpu.pipeline_mode<synchronous>, transform_indices = @transform_3, window_bounds = array<i64: 128, 128>}, {pipeline_mode = #tpu.pipeline_mode<synchronous>, transform_indices = @transform_4, window_bounds = array<i64: 1, 128>}, {transform_indices = @transform_5, window_bounds = array<i64: 16, 128>}]} {
    %c0 = arith.constant 0 : index
    %c0_0 = arith.constant 0 : index
    %0 = vector.load %arg1[%c0, %c0_0] : memref<16x128xf32, #tpu.memory_space<vmem>>, vector<16x128xf32>
    %c0_1 = arith.constant 0 : index
    %c0_2 = arith.constant 0 : index
    %1 = vector.load %arg2[%c0_1, %c0_2] : memref<128x128xf32, #tpu.memory_space<vmem>>, vector<128x128xf32>
    %cst = arith.constant dense<0.000000e+00> : vector<16x128xf32>
    %2 = tpu.matmul %0, %1, %cst {dimension_numbers = #tpu.dot_dimension_numbers<[1], [0], [0], [1], [0, 0, 1, 1], [], []>} : vector<16x128xf32>, vector<128x128xf32>, vector<16x128xf32> -> vector<16x128xf32>
    %c0_3 = arith.constant 0 : index
    %c0_4 = arith.constant 0 : index
    %3 = vector.load %arg3[%c0_3, %c0_4] : memref<1x128xf32, #tpu.memory_space<vmem>>, vector<1x128xf32>
    %4 = vector.broadcast %3 : vector<1x128xf32> to vector<16x128xf32>
    %5 = arith.addf %2, %4 : vector<16x128xf32>
    %cst_5 = arith.constant 0.000000e+00 : f32
    %6 = vector.broadcast %cst_5 : f32 to vector<16x128xf32>
    %7 = arith.maximumf %5, %6 : vector<16x128xf32>
    %c0_6 = arith.constant 0 : index
    %c0_7 = arith.constant 0 : index
    %8 = vector.load %arg4[%c0_6, %c0_7] : memref<128x128xf32, #tpu.memory_space<vmem>>, vector<128x128xf32>
    %cst_8 = arith.constant dense<0.000000e+00> : vector<16x128xf32>
    %9 = tpu.matmul %7, %8, %cst_8 {dimension_numbers = #tpu.dot_dimension_numbers<[1], [0], [0], [1], [0, 0, 1, 1], [], []>} : vector<16x128xf32>, vector<128x128xf32>, vector<16x128xf32> -> vector<16x128xf32>
    %c0_9 = arith.constant 0 : index
    %c0_10 = arith.constant 0 : index
    %10 = vector.load %arg5[%c0_9, %c0_10] : memref<1x128xf32, #tpu.memory_space<vmem>>, vector<1x128xf32>
    %11 = vector.broadcast %10 : vector<1x128xf32> to vector<16x128xf32>
    %12 = arith.addf %0, %11 : vector<16x128xf32>
    %13 = arith.addf %9, %12 : vector<16x128xf32>
    %c0_11 = arith.constant 0 : index
    %c0_12 = arith.constant 0 : index
    %14 = vector.load %arg6[%c0_11, %c0_12] : memref<16x128xf32, #tpu.memory_space<vmem>>, vector<16x128xf32>
    tpu.vector_store %arg6[%c0_11, %c0_12], %13 {strides = array<i32>} : memref<16x128xf32, #tpu.memory_space<vmem>>, vector<16x128xf32>,
    return
  }
  func.func @transform_0(%arg0: i32) -> (i32, i32) {
    %c0_i32 = arith.constant 0 : i32
    %c0_i32_0 = arith.constant 0 : i32
    return %arg0, %c0_i32 : i32, i32
  }
  func.func @transform_1(%arg0: i32) -> (i32, i32) {
    %c0_i32 = arith.constant 0 : i32
    %c0_i32_0 = arith.constant 0 : i32
    %c0_i32_1 = arith.constant 0 : i32
    return %c0_i32, %c0_i32_0 : i32, i32
  }
  func.func @transform_2(%arg0: i32) -> (i32, i32) {
    %c0_i32 = arith.constant 0 : i32
    %c0_i32_0 = arith.constant 0 : i32
    %c0_i32_1 = arith.constant 0 : i32
    return %c0_i32, %c0_i32_0 : i32, i32
  }
  func.func @transform_3(%arg0: i32) -> (i32, i32) {
    %c0_i32 = arith.constant 0 : i32
    %c0_i32_0 = arith.constant 0 : i32
    %c0_i32_1 = arith.constant 0 : i32
    return %c0_i32, %c0_i32_0 : i32, i32
  }
  func.func @transform_4(%arg0: i32) -> (i32, i32) {
    %c0_i32 = arith.constant 0 : i32
    %c0_i32_0 = arith.constant 0 : i32
    %c0_i32_1 = arith.constant 0 : i32
    return %c0_i32, %c0_i32_0 : i32, i32
  }
  func.func @transform_5(%arg0: i32) -> (i32, i32) {
    %c0_i32 = arith.constant 0 : i32
    %c0_i32_0 = arith.constant 0 : i32
    return %arg0, %c0_i32 : i32, i32
  }
}

</mosaic_0001>

<bundles_post_ra>
// kernel: tpu_custom_call.1
= control target key start
LH: loop header
LB: loop body
LE: loop exit
PB: predicated region body
PF: predicated region fallthrough
CT: control target
= control target key end

     0   :  { %10 = vsyncpa [#allocation3], 0  ;;  %s669_s0 = inlined_call_operand.hbm [shape: f32[16,128], index: 0, kind: input, shape index: {}]   ;;  %s670_s1 = inlined_call_operand.hbm [shape: f32[128,128], index: 1, kind: input, shape index: {}]   ;;  %s671_s2 = inlined_call_operand.vmem [shape: f32[1,128], index: 2, kind: input, shape index: {}]   ;;  %s672_s3 = inlined_call_operand.hbm [shape: f32[128,128], index: 3, kind: input, shape index: {}]   ;;  %s673_s4 = inlined_call_operand.vmem [shape: f32[1,128], index: 4, kind: input, shape index: {}]   ;;  %s674_s5 = inlined_call_operand.hbm [shape: f32[16,128], index: 5, kind: output, shape index: {}]  }
   0x1   :  { %11 = vsyncpa [#allocation6], 0 }
   0x2   :  { %12 = vsyncpa [#allocation4], 0  ;;  %s556_s18 = smov [#allocation5]   ;;  %s557_s20 = smov [#allocation2]  }
   0x3   :  { %s30_s19 = sshll.u32 %s556_s18, 4  ;;  %s18_s21 = sshll.u32 %s557_s20, 4  ;;  %s31_s19 = int_to_ptr.vmem [resolvable:$true] %s30_s19  ;;  %s592_s21 = int_to_ptr.vmem [resolvable:$true] %s18_s21 }
   0x4   :  { %s462_s24 = scalar_lea.hbm %s670_s1, 2048 }
   0x5   :  { %p463_p0 = scmp.ne.s32.totalorder %s670_s1, %s462_s24  ;;  %p466_p1 = scmp.lt.u32.totalorder %s462_s24, %s670_s1 }
   0x7   :  { %p468_p2 = pnand %p466_p1, %p463_p0 }
   0x9   :  { %471 = shalt.err (!%p468_p2)
}
   0xa   :  { %s472_s29 = scalar_lea.vmem %s31_s19, 2048  ;;  %p477_p4 = scmp.lt.s32.totalorder %s31_s19, %s31_s19 }
   0xb   :  { %p473_p3 = scmp.ne.s32.totalorder %s31_s19, %s472_s29  ;;  %p478_p5 = scmp.lt.s32.totalorder %s472_s29, %s472_s29 }
   0xd   :  { %p479_p6 = por %p478_p5, %p477_p4 }
   0xf   :  { %p480_p7 = pnand %p479_p6, %p473_p3 }
  0x11   :  { %483 = shalt.err (!%p480_p7)
}
  0x12   :  { %s558_s30 = smov 128   ;;  %s559_s6 = smov 8  }
  0x13   :  { %36 = dma.hbm_to_vmem [thread:$0]  %s670_s1, 2048, %s31_s19, [#allocation6], %s558_s30, %s558_s30, %s559_s6  }
  0x14   :  { %s484_s11 = scalar_lea.hbm %s669_s0, 256 }
  0x15   :  { %p485_p8 = scmp.ne.s32.totalorder %s669_s0, %s484_s11  ;;  %p488_p9 = scmp.lt.u32.totalorder %s484_s11, %s669_s0 }
  0x17   :  { %p490_p10 = pnand %p488_p9, %p485_p8 }
  0x19   :  { %493 = shalt.err (!%p490_p10)
}
  0x1a   :  { %s494_s16 = scalar_lea.vmem %s592_s21, 256  ;;  %p499_p12 = scmp.lt.s32.totalorder %s592_s21, %s592_s21 }
  0x1b   :  { %p495_p11 = scmp.ne.s32.totalorder %s592_s21, %s494_s16  ;;  %p500_p13 = scmp.lt.s32.totalorder %s494_s16, %s494_s16 }
  0x1d   :  { %p501_p0 = por %p500_p13, %p499_p12 }
  0x1f   :  { %p502_p1 = pnand %p501_p0, %p495_p11 }
  0x21   :  { %505 = shalt.err (!%p502_p1)
}
  0x22   :  { %24 = dma.hbm_to_vmem [thread:$0]  %s669_s0, 256, %s592_s21, [#allocation3], %s558_s30, %s558_s30, %s559_s6  }
  0x23   :  { %s560_s18 = smov [#allocation7]   ;;  %s506_s23 = scalar_lea.hbm %s672_s3, 2048 }
  0x24   :  { %s44_s19 = sshll.u32 %s560_s18, 4  ;;  %p507_p2 = scmp.ne.s32.totalorder %s672_s3, %s506_s23  ;;  %s45_s19 = int_to_ptr.vmem [resolvable:$true] %s44_s19 }
  0x25   :  { %p510_p3 = scmp.lt.u32.totalorder %s506_s23, %s672_s3 }
  0x27   :  { %p512_p4 = pnand %p510_p3, %p507_p2 }
  0x29   :  { %515 = shalt.err (!%p512_p4)
}
  0x2a   :  { %s516_s28 = scalar_lea.vmem %s45_s19, 2048  ;;  %p521_p6 = scmp.lt.s32.totalorder %s45_s19, %s45_s19 }
  0x2b   :  { %p517_p5 = scmp.ne.s32.totalorder %s45_s19, %s516_s28  ;;  %p522_p7 = scmp.lt.s32.totalorder %s516_s28, %s516_s28 }
  0x2d   :  { %p523_p8 = por %p522_p7, %p521_p6 }
  0x2f   :  { %p524_p9 = pnand %p523_p8, %p517_p5 }
  0x31   :  { %527 = shalt.err (!%p524_p9)
}
  0x32   :  { %50 = dma.hbm_to_vmem [thread:$0]  %s672_s3, 2048, %s45_s19, [#allocation6], %s558_s30, %s558_s30, %s559_s6  }
  0x33   :  { %550 = dma.done.wait [#allocation3], 256  }
  0x34   :  { %551 = vsyncadd [#allocation3], 4294967040 }
  0x35   :  { %552 = dma.done.wait [#allocation6], 4096  }
  0x36   :  { %553 = vsyncadd [#allocation6], 4294963200  ;;  %v64_v0 = vld [vmem:[#allocation5] sm:$0xff]  ;;  %v65_v1 = vld [vmem:[#allocation5 + $0x8] sm:$0xff]  ;;  %s561_s9 = smov [#allocation8]  }
  0x37   :  { %v66_v2 = vld [vmem:[#allocation5 + $0x10] sm:$0xff]  ;;  %v392_v3 = vpack.c.bf16 %v65_v1, %v64_v0  ;;  %v67_v4 = vld [vmem:[#allocation5 + $0x18] sm:$0xff]  ;;  %v68_v6 = vld [vmem:[#allocation5 + $0x20] sm:$0xff]  ;;  %s271_s10 = sshll.u32 %s561_s9, 4  ;;  %s272_s10 = int_to_ptr.vmem [resolvable:$true] %s271_s10 }
  0x38   :  { %v396_v5 = vpack.c.bf16 %v67_v4, %v66_v2  ;;  %v69_v7 = vld [vmem:[#allocation5 + $0x28] sm:$0xff]  ;;  %v70_v9 = vld [vmem:[#allocation5 + $0x30] sm:$0xff]  ;;  %v71_v11 = vld [vmem:[#allocation5 + $0x38] sm:$0xff]  ;;  %p533_p11 = scmp.lt.s32.totalorder %s272_s10, %s272_s10 }
  0x39   :  { %393 = vmatprep.subr.bf16.mxu0 %v392_v3  ;;  %v400_v8 = vpack.c.bf16 %v69_v7, %v68_v6  ;;  %v644_v10 = vld [vmem:[#allocation2] sm:$0xff]  ;;  %v164_v12 = vld [vmem:[#allocation7] sm:$0xff]  ;;  %v165_v13 = vld [vmem:[#allocation7 + $0x8] sm:$0xff]  ;;  %v404_v20 = vpack.c.bf16 %v71_v11, %v70_v9 }
  0x3a   :  { %395 = vmatpush3.bf16.msra.mxu0 %v392_v3  ;;  %354 = vmatprep.mubr.f32.mxu0 %v644_v10  ;;  %v424_v14 = vpack.c.bf16 %v165_v13, %v164_v12  ;;  %v166_v15 = vld [vmem:[#allocation7 + $0x10] sm:$0xff]  ;;  %v167_v16 = vld [vmem:[#allocation7 + $0x18] sm:$0xff]  ;;  %v168_v18 = vld [vmem:[#allocation7 + $0x20] sm:$0xff] }
  0x3b   :  { %397 = vmatprep.subr.bf16.mxu0 %v396_v5  ;;  %v428_v17 = vpack.c.bf16 %v167_v16, %v166_v15  ;;  %v169_v19 = vld [vmem:[#allocation7 + $0x28] sm:$0xff]  ;;  %v72_v21 = vld [vmem:[#allocation5 + $0x40] sm:$0xff]  ;;  %v170_v24 = vld [vmem:[#allocation7 + $0x30] sm:$0xff] }
  0x3c   :  { %425 = vmatprep.subr.bf16.mxu1 %v424_v14  ;;  %v73_v22 = vld [vmem:[#allocation5 + $0x48] sm:$0xff]  ;;  %v432_v23 = vpack.c.bf16 %v169_v19, %v168_v18  ;;  %v171_v25 = vld [vmem:[#allocation7 + $0x38] sm:$0xff]  ;;  %v74_v27 = vld [vmem:[#allocation5 + $0x50] sm:$0xff] }
  0x3d   :  { %427 = vmatpush3.bf16.msra.mxu1 %v424_v14  ;;  %v408_v26 = vpack.c.bf16 %v73_v22, %v72_v21  ;;  %v75_v28 = vld [vmem:[#allocation5 + $0x58] sm:$0xff]  ;;  %v436_v29 = vpack.c.bf16 %v171_v25, %v170_v24  ;;  %v172_v30 = vld [vmem:[#allocation7 + $0x40] sm:$0xff]  ;;  %v173_v31 = vld [vmem:[#allocation7 + $0x48] sm:$0xff] }
  0x3e   :  { %399 = vmatpush3.bf16.msra.mxu0 %v396_v5  ;;  %429 = vmatprep.subr.bf16.mxu1 %v428_v17  ;;  %v412_v32 = vpack.c.bf16 %v75_v28, %v74_v27  ;;  %v76_v33 = vld [vmem:[#allocation5 + $0x60] sm:$0xff]  ;;  %v77_v34 = vld [vmem:[#allocation5 + $0x68] sm:$0xff]  ;;  %v440_v35 = vpack.c.bf16 %v173_v31, %v172_v30  ;;  %v174_v36 = vld [vmem:[#allocation7 + $0x50] sm:$0xff] }
  0x3f   :  { %401 = vmatprep.subr.bf16.mxu0 %v400_v8  ;;  %v175_v37 = vld [vmem:[#allocation7 + $0x58] sm:$0xff]  ;;  %v416_v38 = vpack.c.bf16 %v77_v34, %v76_v33  ;;  %v78_v39 = vld [vmem:[#allocation5 + $0x70] sm:$0xff]  ;;  %v176_v42 = vld [vmem:[#allocation7 + $0x60] sm:$0xff] }
  0x40   :  { %v79_v40 = vld [vmem:[#allocation5 + $0x78] sm:$0xff]  ;;  %v444_v41 = vpack.c.bf16 %v175_v37, %v174_v36  ;;  %v177_v43 = vld [vmem:[#allocation7 + $0x68] sm:$0xff]  ;;  %v178_v47 = vld [vmem:[#allocation7 + $0x70] sm:$0xff] }
  0x41   :  { %431 = vmatpush3.bf16.msra.mxu1 %v428_v17  ;;  %v420_v44 = vpack.c.bf16 %v79_v40, %v78_v39  ;;  %v448_v45 = vpack.c.bf16 %v177_v43, %v176_v42  ;;  %v63_v46 = vld [vmem:[#allocation2 + $0x8] sm:$0xff]  ;;  %v284_v50 = vld [vmem:[%s671_s2] ss:$0 sm:$0xff]  ;;  %s528_s2 = scalar_lea.vmem %s272_s10, 256 }
  0x42   :  { %403 = vmatpush3.bf16.msra.mxu0 %v400_v8  ;;  %433 = vmatprep.subr.bf16.mxu1 %v432_v23  ;;  %v179_v48 = vld [vmem:[#allocation7 + $0x78] sm:$0xff]  ;;  %v285_v57 = vld [vmem:[%s673_s4] ss:$0 sm:$0xff]  ;;  %p529_p10 = scmp.ne.s32.totalorder %s272_s10, %s528_s2  ;;  %p534_p12 = scmp.lt.s32.totalorder %s528_s2, %s528_s2 }
  0x43   :  { %405 = vmatprep.subr.bf16.mxu0 %v404_v20  ;;  %v452_v49 = vpack.c.bf16 %v179_v48, %v178_v47  ;;  %v188_v58 = vadd.f32 %v285_v57, %v63_v46  ;;  %v187_v59 = vadd.f32 %v285_v57, %v644_v10 }
  0x44   :  { %p535_p13 = por %p534_p12, %p533_p11 }
  0x45   :  { %435 = vmatpush3.bf16.msra.mxu1 %v432_v23 }
  0x46   :  { %407 = vmatpush3.bf16.msra.mxu0 %v404_v20  ;;  %437 = vmatprep.subr.bf16.mxu1 %v436_v29  ;;  %p536_p0 = pnand %p535_p13, %p529_p10 }
  0x47   :  { %409 = vmatprep.subr.bf16.mxu0 %v408_v26 }
  0x49   :  { %439 = vmatpush3.bf16.msra.mxu1 %v436_v29 }
  0x4a   :  { %411 = vmatpush3.bf16.msra.mxu0 %v408_v26  ;;  %441 = vmatprep.subr.bf16.mxu1 %v440_v35 }
  0x4b   :  { %413 = vmatprep.subr.bf16.mxu0 %v412_v32 }
  0x4d   :  { %443 = vmatpush3.bf16.msra.mxu1 %v440_v35 }
  0x4e   :  { %415 = vmatpush3.bf16.msra.mxu0 %v412_v32  ;;  %445 = vmatprep.subr.bf16.mxu1 %v444_v41 }
  0x4f   :  { %417 = vmatprep.subr.bf16.mxu0 %v416_v38 }
  0x51   :  { %447 = vmatpush3.bf16.msra.mxu1 %v444_v41 }
  0x52   :  { %419 = vmatpush3.bf16.msra.mxu0 %v416_v38  ;;  %449 = vmatprep.subr.bf16.mxu1 %v448_v45 }
  0x53   :  { %421 = vmatprep.subr.bf16.mxu0 %v420_v44 }
  0x55   :  { %451 = vmatpush3.bf16.msra.mxu1 %v448_v45 }
  0x56   :  { %423 = vmatpush3.bf16.msra.mxu0 %v420_v44  ;;  %453 = vmatprep.subr.bf16.mxu1 %v452_v49 }
  0x59   :  { %355 = vmatmul.mubr.f32.vlgmr.msra.gmra.mrb[0].mxu0 %v63_v46  ;;  %455 = vmatpush3.bf16.msra.mxu1 %v452_v49 }
 0x12c   :  { %v356_v51 = vpop.f32.mrb[0].mxu0 }
 0x12d   :  { %v159_v52 = vadd.f32 %v356_v51, %v284_v50  ;;  %v153_v53 = vpop.f32.mrb[1].mxu0 }
 0x12e   :  { %v154_v54 = vadd.f32 %v284_v50, %v153_v53 }
 0x12f   :  { %v163_v56 = vmax.f32 %v159_v52, 0.0 }
 0x130   :  { %v162_v55 = vmax.f32 %v154_v54, 0.0 }
 0x132   :  { %389 = vmatprep.mubr.f32.mxu1 %v162_v55 }
 0x133   :  { %390 = vmatmul.mubr.f32.vlgmr.msra.gmra.mrb[0].mxu1 %v163_v56 }
 0x206   :  { %v391_v60 = vpop.f32.mrb[0].mxu1 }
 0x207   :  { %v261_v61 = vadd.f32 %v391_v60, %v188_v58  ;;  %v255_v62 = vpop.f32.mrb[1].mxu1 }
 0x208   :  { %v256_v63 = vadd.f32 %v255_v62, %v187_v59 }
 0x209   :  { %265 = vst [vmem:[#allocation8 + $0x8] sm:$0xff] %v261_v61 }
 0x20a   :  { %264 = vst [vmem:[#allocation8] sm:$0xff] %v256_v63 }
 0x20b   :  { %539 = shalt.err (!%p536_p0)
}
 0x20c   :  { %s540_s12 = scalar_lea.hbm %s674_s5, 256 }
 0x20d   :  { %p541_p1 = scmp.ne.s32.totalorder %s674_s5, %s540_s12  ;;  %p544_p2 = scmp.lt.u32.totalorder %s540_s12, %s674_s5 }
 0x20f   :  { %p546_p3 = pnand %p544_p2, %p541_p1 }
 0x211   :  { %549 = shalt.err (!%p546_p3)
}
 0x212   :  { %277 = dma.vmem_to_hbm [thread:$0]  %s272_s10, 256, %s674_s5, [#allocation4], %s558_s30, %s558_s30, %s559_s6  }
 0x213   :  { %554 = dma.done.wait [#allocation4], 256  }
 0x214   :  { %555 = vsyncadd [#allocation4], 4294967040 }
 0x215   :  { %281 = vsyncpa [#allocation3], 1 }
 0x216   :  { %282 = vsyncpa [#allocation6], 1 }
 0x217   :  { %283 = vsyncpa [#allocation4], 1 }

</bundles_post_ra>
